<compile_context>
chip_gen: v5e
topology: v5e:2x2
jax: 0.10.0
libtpu: 0.0.40
codegen_flags: <defaults>
</compile_context>

<pallas_src>
import jax
import jax.numpy as jnp
import numpy as np
from jax.experimental import pallas as pl
from jax.experimental.pallas import tpu as pltpu


def _norm_kernel(x_ref, mean_ref, inv_std_ref, o_ref):
    """out = (x - mean_row) * inv_std_row, broadcast along the lane axis.

    x_ref / o_ref: (tr, tn)   mean_ref / inv_std_ref: (tr, 1)
    """
    o_ref[...] = ((x_ref[...] - mean_ref[...]) * inv_std_ref[...]).astype(o_ref.dtype)


def _vmem_budget_bytes():
    """Per-generation working-set budget (and physical VMEM capacity)."""
    cap = None
    try:
        cap = getattr(pltpu.get_tpu_info(), "vmem_capacity_bytes", None)
    except Exception:
        cap = None
    if not cap:
        cap = 64 << 20                       # conservative (v7x per-TC) fallback
    # Double-buffered in+out working-set budget:
    #   v7x (64 MiB physical)  -> 40 MiB ;  v5e/v6e (128 MiB) -> 80 MiB
    budget = max(16 << 20, min((cap * 5) // 8, 80 << 20))
    return budget, cap


def _pick_tiles(R, N, itemsize, budget):
    """Pick (tr, tn) for the lane-dense (R, N) stream.

    Double-buffered in+out working set ~= 4 * tr * tn * itemsize bytes.
    tn is a multiple of 128 (or the full N); tr is a dtype-aware multiple of
    the minimum sublane tile (or the full R).
    """
    sublane = {4: 8, 2: 16, 1: 32}.get(itemsize, 32)
    per_cell = 4 * itemsize                  # 2 input + 2 output buffers / elem

    tr = R
    # Only for very large B*C: even one 128-lane stripe of all rows is too big.
    if tr * 128 * per_cell > budget:
        tr = min(R, max(sublane,
                        (budget // (128 * per_cell)) // sublane * sublane))

    tn_cap = max(128, (budget // (per_cell * tr)) // 128 * 128)
    tn = N if N <= tn_cap else tn_cap

    # v7x megacore: a big stream that fits in a single block should still split
    # across the two TensorCores.
    if (R * N * itemsize >= (4 << 20) and N >= 256
            and pl.cdiv(R, tr) * pl.cdiv(N, tn) < 2):
        tn = max(128, pl.cdiv(pl.cdiv(N, 2), 128) * 128)

    return tr, tn


def normalize(img, mean, inv_std):
    """Pallas forward of the Normalization module on an NCHW image batch."""
    B, C, H, W = img.shape
    R, N = B * C, H * W
    dt = img.dtype

    x2 = img.reshape(R, N)                   # free reshape, stays contiguous

    # Per-row (per-channel) constants, broadcast-ready columns.
    mean_col = jnp.tile(mean.astype(dt), B).reshape(R, 1)
    inv_col = jnp.tile(inv_std.astype(dt), B).reshape(R, 1)

    budget, cap = _vmem_budget_bytes()
    tr, tn = _pick_tiles(R, N, dt.itemsize, budget)
    grid = (pl.cdiv(R, tr), pl.cdiv(N, tn))

    total = R * N
    cost = pl.CostEstimate(
        flops=2 * total,                     # one sub + one mul per element
        transcendentals=0,
        bytes_accessed=2 * total * dt.itemsize,
    )

    vmem_limit = int(max(32 << 20, min(cap - (4 << 20), budget + (16 << 20))))

    out2 = pl.pallas_call(
        _norm_kernel,
        out_shape=jax.ShapeDtypeStruct((R, N), dt),
        grid=grid,
        in_specs=[
            pl.BlockSpec((tr, tn), lambda i, j: (i, j)),
            pl.BlockSpec((tr, 1), lambda i, j: (i, 0)),
            pl.BlockSpec((tr, 1), lambda i, j: (i, 0)),
        ],
        out_specs=pl.BlockSpec((tr, tn), lambda i, j: (i, j)),
        compiler_params=pltpu.CompilerParams(
            dimension_semantics=("parallel", "parallel"),
            vmem_limit_bytes=vmem_limit,
        ),
        cost_estimate=cost,
    )(x2, mean_col, inv_col)

    return out2.reshape(B, C, H, W)


class NormalizationPallas:
    """JAX/Pallas equivalent of the PyTorch Normalization module."""

    def __init__(self):
        self.mean = jnp.asarray([0.485, 0.456, 0.406], dtype=jnp.float32)
        self.std = jnp.asarray([0.229, 0.224, 0.225], dtype=jnp.float32)
        # Fold the division into a multiply by the (module-constant) reciprocal.
        self.inv_std = (1.0 / self.std).astype(jnp.float32)

    def __call__(self, img):
        added_batch = False
        if img.ndim == 3:                    # (C, H, W) -> (1, C, H, W)
            img = img[None]
            added_batch = True
        out = normalize(img, self.mean, self.inv_std)
        return out[0] if added_batch else out


if __name__ == "__main__":
    key = jax.random.PRNGKey(0)
    k1, k2 = jax.random.split(key)

    norm = NormalizationPallas()

    np_mean = np.array([0.485, 0.456, 0.406], np.float32).reshape(1, 3, 1, 1)
    np_std = np.array([0.229, 0.224, 0.225], np.float32).reshape(1, 3, 1, 1)

    # Batched NCHW input: 3 channels, as the module's mean/std imply.
    img = jax.random.uniform(k1, (2, 3, 16, 16), dtype=jnp.float32)
    out = jax.block_until_ready(norm(img))
    ref = (np.asarray(img) - np_mean) / np_std
    assert out.shape == img.shape
    assert np.allclose(np.asarray(out), ref, rtol=1e-5, atol=1e-6), (
        float(np.abs(np.asarray(out) - ref).max()))

    # Unbatched (C, H, W) input, as used before batching in the NST pipeline.
    img3 = jax.random.uniform(k2, (3, 16, 16), dtype=jnp.float32)
    out3 = jax.block_until_ready(norm(img3))
    ref3 = (np.asarray(img3) - np_mean[0]) / np_std[0]
    assert out3.shape == img3.shape
    assert np.allclose(np.asarray(out3), ref3, rtol=1e-5, atol=1e-6)

    print("KERNEL_OK")
</pallas_src>

<mosaic_0001>
module attributes {stable_mosaic.version = 11 : i64} {
  func.func @_norm_kernel(%arg0: i32, %arg1: i32, %arg2: memref<6x256xf32, #tpu.memory_space<vmem>>, %arg3: memref<6x1xf32, #tpu.memory_space<vmem>>, %arg4: memref<6x1xf32, #tpu.memory_space<vmem>>, %arg5: memref<6x256xf32, #tpu.memory_space<vmem>>) attributes {dimension_semantics = [#tpu.dimension_semantics<parallel>, #tpu.dimension_semantics<parallel>], iteration_bounds = array<i64: 1, 1>, scalar_prefetch = 0 : i64, scratch_operands = 0 : i64, tpu.core_type = #tpu.core_type<tc>, window_params = [{transform_indices = @transform_0, window_bounds = array<i64: 6, 256>}, {transform_indices = @transform_1, window_bounds = array<i64: 6, 1>}, {transform_indices = @transform_2, window_bounds = array<i64: 6, 1>}, {transform_indices = @transform_3, window_bounds = array<i64: 6, 256>}]} {
    %c0 = arith.constant 0 : index
    %c0_0 = arith.constant 0 : index
    %0 = vector.load %arg2[%c0, %c0_0] : memref<6x256xf32, #tpu.memory_space<vmem>>, vector<6x256xf32>
    %c0_1 = arith.constant 0 : index
    %c0_2 = arith.constant 0 : index
    %1 = vector.load %arg3[%c0_1, %c0_2] : memref<6x1xf32, #tpu.memory_space<vmem>>, vector<6x1xf32>
    %2 = vector.broadcast %1 : vector<6x1xf32> to vector<6x256xf32>
    %3 = arith.subf %0, %2 : vector<6x256xf32>
    %c0_3 = arith.constant 0 : index
    %c0_4 = arith.constant 0 : index
    %4 = vector.load %arg4[%c0_3, %c0_4] : memref<6x1xf32, #tpu.memory_space<vmem>>, vector<6x1xf32>
    %5 = vector.broadcast %4 : vector<6x1xf32> to vector<6x256xf32>
    %6 = arith.mulf %3, %5 : vector<6x256xf32>
    %c0_5 = arith.constant 0 : index
    %c0_6 = arith.constant 0 : index
    %7 = vector.load %arg5[%c0_5, %c0_6] : memref<6x256xf32, #tpu.memory_space<vmem>>, vector<6x256xf32>
    tpu.vector_store %arg5[%c0_5, %c0_6], %6 {strides = array<i32>} : memref<6x256xf32, #tpu.memory_space<vmem>>, vector<6x256xf32>,
    return
  }
  func.func @transform_0(%arg0: i32, %arg1: i32) -> (i32, i32) {
    %c0_i32 = arith.constant 0 : i32
    return %arg0, %arg1 : i32, i32
  }
  func.func @transform_1(%arg0: i32, %arg1: i32) -> (i32, i32) {
    %c0_i32 = arith.constant 0 : i32
    %c0_i32_0 = arith.constant 0 : i32
    return %arg0, %c0_i32 : i32, i32
  }
  func.func @transform_2(%arg0: i32, %arg1: i32) -> (i32, i32) {
    %c0_i32 = arith.constant 0 : i32
    %c0_i32_0 = arith.constant 0 : i32
    return %arg0, %c0_i32 : i32, i32
  }
  func.func @transform_3(%arg0: i32, %arg1: i32) -> (i32, i32) {
    %c0_i32 = arith.constant 0 : i32
    return %arg0, %arg1 : i32, i32
  }
}

</mosaic_0001>

<bundles_post_ra>
// kernel: tpu_custom_call.1
= control target key start
LH: loop header
LB: loop body
LE: loop exit
PB: predicated region body
PF: predicated region fallthrough
CT: control target
= control target key end

     0   :  { %v80_v1 = vmov 0   ;;  %s117_s0 = inlined_call_operand.vmem [shape: f32[6,256], index: 0, kind: input, shape index: {}]   ;;  %s118_s1 = inlined_call_operand.vmem [shape: f32[6,1], index: 1, kind: input, shape index: {}]   ;;  %s119_s2 = inlined_call_operand.vmem [shape: f32[6,1], index: 2, kind: input, shape index: {}]   ;;  %s120_s3 = inlined_call_operand.hbm [shape: f32[6,256], index: 3, kind: output, shape index: {}]  }
   0x1   :  { %v17_v0 = vld [vmem:[%s118_s1] sm:$0x3f]  ;;  %53 = vset.pattern.permute.xlu0 %v80_v1 }
   0x2   :  { %8 = vsyncpa [#allocation3], 0  ;;  %20 = vperm.xlu0 %53, %v17_v0   ;;  %v25_v2 = vld [vmem:[%s119_s2] sm:$0x3f]  ;;  %v16_v5 = vld [vmem:[%s117_s0 + $0x8] sm:$0x3f] }
   0x3   :  { %v15_v4 = vld [vmem:[%s117_s0] sm:$0x3f]  ;;  %s81_s1 = smov [#allocation2]   ;;  %s42_s23 = sshll.u32 %s120_s3, 4  ;;  %s43_s23 = int_to_ptr.hbm [resolvable:$true] %s42_s23 }
   0x4   :  { %s40_s20 = sshll.u32 %s81_s1, 4  ;;  %s41_s20 = int_to_ptr.vmem [resolvable:$true] %s40_s20 }
   0xa   :  { %28 = vperm.xlu0 %53, %v25_v2  }
  0x74   :  { %v21_v3 = vpop.permute.xlu0 %20 }
  0x75   :  { %v23_v6 = vsub.f32 %v15_v4, %v21_v3  ;;  %v24_v7 = vsub.f32 %v16_v5, %v21_v3 }
  0x7c   :  { %v29_v8 = vpop.permute.xlu0 %28 }
  0x7d   :  { %v31_v9 = vmul.f32 %v29_v8, %v23_v6  ;;  %v32_v10 = vmul.f32 %v29_v8, %v24_v7 }
  0x7f   :  { %33 = vst [vmem:[#allocation2] sm:$0x3f] %v31_v9 }
  0x80   :  { %34 = vst [vmem:[#allocation2 + $0x8] sm:$0x3f] %v32_v10 }
  0x81   :  { %45 = dma.vmem_to_hbm [thread:$0]  %s41_s20, 256, %s43_s23, [#allocation3]  }
  0x82   :  { %78 = dma.done.wait [#allocation3], 256  }
  0x83   :  { %79 = vsyncadd [#allocation3], 4294967040 }
  0x84   :  { %50 = vsyncpa [#allocation3], 1 }

</bundles_post_ra>
